<compile_context>
chip_gen: v5e
topology: v5e:2x2
jax: 0.10.0
libtpu: 0.0.40
codegen_flags: <defaults>
</compile_context>

<pallas_src>
import numpy as np
import jax
import jax.numpy as jnp
from jax.experimental import pallas as pl
from jax.experimental.pallas import tpu as pltpu

_LANE = 128
_SUBLANE = 8


def _affine_kernel(scale_ref, bias_ref, x_ref, o_ref):
    # out = (1 + gamma) * x + beta; scale = 1 + gamma precomputed in wrapper.
    # scale/bias are (c_blk, 1) columns that broadcast along the lane dim.
    o_ref[...] = x_ref[...] * scale_ref[...] + bias_ref[...]


def _bias_kernel(bias_ref, x_ref, o_ref):
    # out = x + h; per-(batch, channel) column broadcast along lanes.
    o_ref[...] = x_ref[...] + bias_ref[...]


def _round_up(v, m):
    return -(-v // m) * m


def _choose_tiles(rows, hw, itemsize, max_block_bytes=2 << 20):
    """Pick (c_blk, hw_blk) for a (rows, hw) elementwise kernel.

    hw_blk is a multiple of 128 (lane-dense stores) unless hw itself is
    smaller; c_blk is a multiple of 8 unless rows itself is smaller; the x
    block is capped at max_block_bytes so the double-buffered in+out pipeline
    stays inside every generation's default scoped VMEM limit.  Ragged edges
    are handled by the cdiv grid, so no "full extent" fallback is ever needed.
    """
    if hw <= _LANE:
        hw_blk = hw                                    # full-extent exception
    else:
        hw_blk = min(2048, _round_up(hw, _LANE))

    if rows <= _SUBLANE:
        c_blk = rows                                   # full-extent exception
    else:
        budget_rows = max(
            _SUBLANE,
            (max_block_bytes // (hw_blk * itemsize)) // _SUBLANE * _SUBLANE)
        c_blk = min(_round_up(rows, _SUBLANE), budget_rows)

    # v7x has 2 TensorCores per chip: make sure at least one "parallel" grid
    # axis has >= 2 blocks whenever there is enough work to split.
    if pl.cdiv(rows, c_blk) * pl.cdiv(hw, hw_blk) < 2:
        if hw_blk >= 2 * _LANE:
            hw_blk = max(_LANE, (hw_blk // 2) // _LANE * _LANE)
        elif c_blk >= 2 * _SUBLANE:
            c_blk = max(_SUBLANE, (c_blk // 2) // _SUBLANE * _SUBLANE)
    return c_blk, hw_blk


def fuse_weight_embedding(x, noise_embed, w, b, *, use_affine_level=False):
    """x: (B, C, H, W) NCHW; noise_embed: (B, C_in);
    w: (C_hid, C_in) (PyTorch nn.Linear layout); b: (C_hid,)."""
    n, c, hgt, wid = x.shape
    hw = hgt * wid
    c_hid, c_in = w.shape
    assert c_hid == c * (2 if use_affine_level else 1)
    assert noise_embed.shape == (n, c_in)

    # Tiny Linear + SiLU, hoisted out of the kernel per the perf review: it
    # fuses into surrounding XLA for ~0 cost vs. the bandwidth-bound broadcast.
    h = jax.nn.silu(noise_embed @ w.T + b)             # (B, C_hid)

    rows = n * c
    x2 = x.reshape(rows, hw)                           # free contiguous reshape
    if use_affine_level:
        gamma, beta = jnp.split(h, 2, axis=1)
        scale = (1.0 + gamma).reshape(rows, 1).astype(x.dtype)
        bias = beta.reshape(rows, 1).astype(x.dtype)
    else:
        scale = None
        bias = h.reshape(rows, 1).astype(x.dtype)

    itemsize = np.dtype(x.dtype).itemsize
    c_blk, hw_blk = _choose_tiles(rows, hw, itemsize)
    grid = (pl.cdiv(rows, c_blk), pl.cdiv(hw, hw_blk))

    x_spec = pl.BlockSpec((c_blk, hw_blk), lambda i, j: (i, j))
    col_spec = pl.BlockSpec((c_blk, 1), lambda i, j: (i, 0))

    if use_affine_level:
        kernel = _affine_kernel
        ins = (scale, bias, x2)
        in_specs = [col_spec, col_spec, x_spec]
    else:
        kernel = _bias_kernel
        ins = (bias, x2)
        in_specs = [col_spec, x_spec]

    cost = pl.CostEstimate(
        flops=2 * rows * hw,                           # one FMA per element
        transcendentals=0,
        bytes_accessed=2 * rows * hw * itemsize + (len(ins) - 1) * rows * itemsize)

    # Note: if the caller can donate x, adding input_output_aliases would save
    # the output HBM allocation; left off since x is reused by the test below.
    out = pl.pallas_call(
        kernel,
        out_shape=jax.ShapeDtypeStruct((rows, hw), x.dtype),
        grid=grid,
        in_specs=in_specs,
        out_specs=x_spec,
        compiler_params=pltpu.CompilerParams(
            dimension_semantics=("parallel", "parallel")),
        cost_estimate=cost,
    )(*ins)
    return out.reshape(n, c, hgt, wid)


def forward_reference(x, noise_embed, w, b, *, use_affine_level=False):
    """Pure-JAX reference matching the PyTorch module."""
    h = jax.nn.silu(noise_embed @ w.T + b)
    if use_affine_level:
        gamma, beta = jnp.split(h, 2, axis=1)
        return (1.0 + gamma[:, :, None, None]) * x + beta[:, :, None, None]
    return x + h[:, :, None, None]


if __name__ == "__main__":
    key = jax.random.PRNGKey(0)
    k_x, k_ne, k_w0, k_b0, k_w1, k_b1 = jax.random.split(key, 6)

    B, C, H, W = 2, 4, 16, 16          # small shapes per the module's forward
    C_IN = 32                          # noise-embedding width

    x = jax.random.normal(k_x, (B, C, H, W), jnp.float32)
    noise_embed = jax.random.normal(k_ne, (B, C_IN), jnp.float32)
    bound = 1.0 / np.sqrt(C_IN)

    # --- default path: use_affine_level=False, Linear(C_IN -> C) ---
    w0 = jax.random.uniform(k_w0, (C, C_IN), jnp.float32, -bound, bound)
    b0 = jax.random.uniform(k_b0, (C,), jnp.float32, -bound, bound)
    out = jax.block_until_ready(
        fuse_weight_embedding(x, noise_embed, w0, b0, use_affine_level=False))
    ref = jax.block_until_ready(
        forward_reference(x, noise_embed, w0, b0, use_affine_level=False))
    np.testing.assert_allclose(np.asarray(out), np.asarray(ref),
                               rtol=1e-5, atol=1e-5)
    assert out.shape == (B, C, H, W), out.shape

    # --- affine path: use_affine_level=True, Linear(C_IN -> 2*C) ---
    w1 = jax.random.uniform(k_w1, (2 * C, C_IN), jnp.float32, -bound, bound)
    b1 = jax.random.uniform(k_b1, (2 * C,), jnp.float32, -bound, bound)
    out_a = jax.block_until_ready(
        fuse_weight_embedding(x, noise_embed, w1, b1, use_affine_level=True))
    ref_a = jax.block_until_ready(
        forward_reference(x, noise_embed, w1, b1, use_affine_level=True))
    np.testing.assert_allclose(np.asarray(out_a), np.asarray(ref_a),
                               rtol=1e-5, atol=1e-5)

    print("KERNEL_OK")
</pallas_src>

<mosaic_0001>
module attributes {stable_mosaic.version = 11 : i64} {
  func.func @_bias_kernel(%arg0: i32, %arg1: i32, %arg2: memref<8x1xf32, #tpu.memory_space<vmem>>, %arg3: memref<8x128xf32, #tpu.memory_space<vmem>>, %arg4: memref<8x128xf32, #tpu.memory_space<vmem>>) attributes {dimension_semantics = [#tpu.dimension_semantics<parallel>, #tpu.dimension_semantics<parallel>], iteration_bounds = array<i64: 1, 2>, scalar_prefetch = 0 : i64, scratch_operands = 0 : i64, tpu.core_type = #tpu.core_type<tc>, window_params = [{transform_indices = @transform_0, window_bounds = array<i64: 8, 1>}, {transform_indices = @transform_1, window_bounds = array<i64: 8, 128>}, {transform_indices = @transform_2, window_bounds = array<i64: 8, 128>}]} {
    %c0 = arith.constant 0 : index
    %c0_0 = arith.constant 0 : index
    %0 = vector.load %arg3[%c0, %c0_0] : memref<8x128xf32, #tpu.memory_space<vmem>>, vector<8x128xf32>
    %c0_1 = arith.constant 0 : index
    %c0_2 = arith.constant 0 : index
    %1 = vector.load %arg2[%c0_1, %c0_2] : memref<8x1xf32, #tpu.memory_space<vmem>>, vector<8x1xf32>
    %2 = vector.broadcast %1 : vector<8x1xf32> to vector<8x128xf32>
    %3 = arith.addf %0, %2 : vector<8x128xf32>
    %c0_3 = arith.constant 0 : index
    %c0_4 = arith.constant 0 : index
    %4 = vector.load %arg4[%c0_3, %c0_4] : memref<8x128xf32, #tpu.memory_space<vmem>>, vector<8x128xf32>
    tpu.vector_store %arg4[%c0_3, %c0_4], %3 {strides = array<i32>} : memref<8x128xf32, #tpu.memory_space<vmem>>, vector<8x128xf32>,
    return
  }
  func.func @transform_0(%arg0: i32, %arg1: i32) -> (i32, i32) {
    %c0_i32 = arith.constant 0 : i32
    %c0_i32_0 = arith.constant 0 : i32
    return %arg0, %c0_i32 : i32, i32
  }
  func.func @transform_1(%arg0: i32, %arg1: i32) -> (i32, i32) {
    %c0_i32 = arith.constant 0 : i32
    return %arg0, %arg1 : i32, i32
  }
  func.func @transform_2(%arg0: i32, %arg1: i32) -> (i32, i32) {
    %c0_i32 = arith.constant 0 : i32
    return %arg0, %arg1 : i32, i32
  }
}

</mosaic_0001>

<bundles_post_ra>
// kernel: tpu_custom_call.1
= control target key start
LH: loop header
LB: loop body
LE: loop exit
PB: predicated region body
PF: predicated region fallthrough
CT: control target
= control target key end

     0   :  { %7 = vsyncpa [#allocation3], 0  ;;  %s651_s0 = inlined_call_operand.vmem [shape: f32[8,1], index: 0, kind: input, shape index: {}]   ;;  %s652_s1 = inlined_call_operand.hbm [shape: f32[8,256], index: 1, kind: input, shape index: {}]   ;;  %s653_s2 = inlined_call_operand.hbm [shape: f32[8,256], index: 2, kind: output, shape index: {}]  }
   0x1   :  { %9 = vsyncpa [#allocation3 + $0x1], 0 }
   0x2   :  { %10 = vsyncpa [#allocation4], 0 }
   0x3   :  { %12 = vsyncpa [#allocation4 + $0x1], 0  ;;  %s528_s9 = smov 0   ;;  %s530_s10 = smov 0  }
   0x4   :  { %s532_s11 = smov 0   ;;  %s534_s12 = smov 0  }
   0x5   :  { %s536_s13 = smov 0   ;;  %s538_s14 = smov 0  }
   0x6 LB: > { %s320_s15 = sadd.s32 4294967295, %s510_s14   ;;  %s321_s16 = sadd.s32 4294967294, %s510_s14   ;;  %s510_s14 = sphi %s538_s14, %s18_s14   ;;  %s506_s13 = sphi %s536_s13, %s662_s13   ;;  %s502_s12 = sphi %s534_s12, %s661_s12   ;;  %s498_s11 = sphi %s532_s11, %s660_s11   ;;  %s494_s10 = sphi %s530_s10, %s659_s10   ;;  %s490_s9 = sphi %s528_s9, %s658_s9  }
   0x7   : > { %s27_s17 = sadd.s32 1, %s506_s13  ;;  %s65_s18 = sadd.s32 1, %s498_s11 }
   0x8   : > { %p28_p0 = scmp.ge.s32.totalorder %s27_s17, 2  ;;  %p72_p1 = scmp.ne.s32.totalorder %s498_s11, %s494_s10 }
   0x9   : > { %p73_p2 = scmp.eq.s32.totalorder %s510_s14, 0  ;;  %p78_p3 = scmp.ne.s32.totalorder %s494_s10, %s490_s9 }
   0xa   : > { %s664_s17 = smov (%p28_p0, %s27_s17), 0  ;;  %p79_p5 = scmp.eq.s32.totalorder %s320_s15, 0 }
   0xb   : > { %p569_p4 = por %p73_p2, %p72_p1  ;;  %s61_s20 = ssub.s32 %s506_s13, %s664_s17 }
   0xc   : > { %p104_p6 = scmp.eq.s32.totalorder %s320_s15, 1  ;;  %p63_p7 = scmp.eq.s32.totalorder %s61_s20, 0 }
   0xd   : > { %p575_p8 = por %p79_p5, %p78_p3  ;;  %p110_p10 = scmp.eq.s32.totalorder %s321_s16, 1 }
   0xe   : > { %p579_p9 = por %p104_p6, %p72_p1  ;;  %p324_p12 = scmp.ge.s32.totalorder %s510_s14, 2 }
   0xf   : > { %s584_s23 = scalar_select %p63_p7, %s498_s11, %s65_s18  }
  0x10   : > { %p586_p11 = por %p110_p10, %p78_p3  ;;  %p346_p13 = scmp.lt.s32.totalorder %s510_s14, 2 }
  0x11   : > { %s137_s25 = sand.u32 1, %s498_s11   ;;  %s326_s27 = sshll.u32 %s506_s13, 3 }
  0x12   : > { %s325_s26 = sshll.u32 %s137_s25, 3  ;;  %s147_s30 = scalar_lea.hbm %s652_s1, %s326_s27 }
  0x13   : > { %s141_s3 = scalar_lea.vmem [#allocation2], %s325_s26  ;;  %s149_s5 = sshll.u32 %s147_s30, 4  ;;  %s150_s5 = int_to_ptr.hbm [resolvable:$true] %s149_s5 }
  0x14   : > { %s151_s4 = sshll.u32 %s141_s3, 4  ;;  %p339_p0 = pnand %p346_p13, %p569_p4  ;;  %s152_s4 = int_to_ptr.vmem [resolvable:$true] %s151_s4 }
  0x15   : > { %p327_p1 = scmp.ge.s32.totalorder %s510_s14, 1  ;;  %p156_p2 = scmp.lt.s32.totalorder %s510_s14, 3 }
  0x16   : > { %s138_s6 = scalar_lea.sflag [#allocation3], %s137_s25 }
  0x17   : > { %341 = dma.hbm_to_vmem [thread:$0]  (!%p339_p0), %s150_s5, 128, %s152_s4, %s138_s6  }
  0x18   : > { %p157_p3 = pnand %p327_p1, %p156_p2 }
  0x19   : > { %s602_s7 = sand.u32 (!%p157_p3), 1, %s494_s10  }
  0x1a   : > { %160 = sbr.rel (%p157_p3) target bundleno = 154 (0x9a), region = 28  ;;  %s328_s8 = sshll.u32 (!%p157_p3), %s602_s7, 3 }
  0x1b   : > { %s163_s15 = scalar_lea.sflag (!%p157_p3), [#allocation3], %s602_s7  ;;  %s166_s16 = scalar_lea.vmem (!%p157_p3), [#allocation2], %s328_s8 }
  0x1f   : > { %481 = dma.done.wait (%p575_p8), %s163_s15, 128  }
  0x20   : > { %483 = vsyncadd (%p575_p8), %s163_s15, 4294967168  ;;  %v512_v0 = vmov 0   ;;  %v197_v1 = vld [vmem:[%s651_s0] sm:$0xff]  ;;  %s331_s20 = sshll.u32 %s502_s12, 3  ;;  %s191_s28 = scalar_lea.vmem [#allocation5], %s328_s8 }
  0x21   : > { %397 = vset.pattern.permute.xlu0 %v512_v0  ;;  %s218_s27 = scalar_lea.hbm %s653_s2, %s331_s20  ;;  %v196_v2 = vld [vmem:[%s166_s16] sm:$0xff]  ;;  %s220_s29 = sshll.u32 %s191_s28, 4  ;;  %s221_s29 = int_to_ptr.vmem [resolvable:$true] %s220_s29 }
  0x22   : > { %200 = vperm.xlu0 %397, %v197_v1   ;;  %s222_s21 = sshll.u32 %s218_s27, 4  ;;  %s206_s30 = scalar_lea.sflag [#allocation4], %s602_s7  ;;  %s223_s21 = int_to_ptr.hbm [resolvable:$true] %s222_s21 }
  0x23   : > { %s442_s3 = sshra.s32 %s223_s21, 4  ;;  %s448_s6 = scalar_lea.hbm %s653_s2, 16  ;;  %s443_s3 = int_to_ptr.hbm [resolvable:$true] %s442_s3 }
  0x24   : > { %s444_s4 = scalar_lea.hbm %s443_s3, 8  ;;  %p449_p7 = scmp.lt.s32.totalorder %s443_s3, %s653_s2 }
  0x25   : > { %p445_p4 = scmp.ne.s32.totalorder %s443_s3, %s444_s4  ;;  %p450_p8 = scmp.lt.s32.totalorder %s448_s6, %s444_s4 }
  0x27   : > { %p446_p5 = pnand %p445_p4, %p579_p9  ;;  %p451_p10 = por %p450_p8, %p449_p7 }
  0x29   : > { %p447_p6 = pneg %p446_p5 }
  0x2b   : > { %p452_p13 = pnand %p451_p10, %p447_p6 }
  0x94   : > { %v201_v3 = vpop.permute.xlu0 %200 }
  0x95   : > { %v203_v4 = vadd.f32 %v201_v3, %v196_v2 }
  0x97   : > { %204 = vst [vmem:[%s191_s28] sm:$0xff] %v203_v4 }
  0x98   : > { %455 = shalt.err (!%p452_p13)
}
  0x99   : > { %336 = dma.vmem_to_hbm [thread:$0]  (%p579_p9), %s221_s29, 128, %s223_s21, %s206_s30  }
  0x9a PF: > { %s234_s7 = sand.u32 1, %s490_s9   ;;  %p343_p0 = pnand %p324_p12, %p586_p11 }
  0x9b   : > { %s235_s16 = scalar_lea.sflag [#allocation4], %s234_s7 }
  0x9c   : > { %p344_p1 = pneg %p343_p0 }
  0x9e   : > { %485 = dma.done.wait (%p344_p1), %s235_s16, 128  }
  0x9f   : > { %487 = vsyncadd (%p344_p1), %s235_s16, 4294967168  ;;  %s18_s14 = sadd.s32 1, %s510_s14   ;;  %s658_s9 = smov %s494_s10 }
  0xa0   : > { %p15_p2 = scmp.ge.s32.totalorder %s18_s14, 4   ;;  %s659_s10 = smov %s498_s11 }
  0xa1   : > { %s660_s11 = smov %s584_s23  ;;  %s661_s12 = smov %s506_s13 }
  0xa2   : > { %s662_s13 = smov %s664_s17  ;;  %17 = sbr.rel (!%p15_p2) target bundleno = 6 (0x6), region = 76 }
  0xa7   :  { %241 = vsyncpa [#allocation3], 1 }
  0xa8   :  { %243 = vsyncpa [#allocation3 + $0x1], 1 }
  0xa9   :  { %244 = vsyncpa [#allocation4], 1 }
  0xaa   :  { %246 = vsyncpa [#allocation4 + $0x1], 1 }

</bundles_post_ra>
